<compile_context>
chip_gen: v7x
topology: tpu7x:2x2x1
jax: 0.10.0
libtpu: 0.0.40
codegen_flags: <defaults>
</compile_context>

<pallas_src>
import functools

import jax
import jax.numpy as jnp
from jax import lax
from jax.experimental import pallas as pl
from jax.experimental.pallas import tpu as pltpu

_LANE = 128
_SUBLANE = 8


def _round_up(v, m):
    return ((v + m - 1) // m) * m


def _cdiv(a, b):
    return (a + b - 1) // b


def _eup_supports_bf16():
    # v6e / v7x EUP supports bf16 transcendentals; v5e and older do not.
    try:
        kind = jax.devices()[0].device_kind.lower()
    except Exception:
        return False
    return ("v6" in kind) or ("v7" in kind)


def _vmem_capacity_bytes():
    try:
        return int(getattr(pltpu.get_tpu_info(), "vmem_capacity_bytes",
                           64 * 1024 * 1024))
    except Exception:
        return 64 * 1024 * 1024  # conservative fallback (v7x-sized)


def _proxy_loss_kernel(use_bf16_exp,
                       meta_ref, invt_ref, x_ref, pT_ref, y_ref,
                       loss_part_ref, corr_part_ref):
    i = pl.program_id(0)
    tn = x_ref.shape[0]
    cp = pT_ref.shape[1]

    n_valid = meta_ref[0]          # true batch size (masks the partial last tile)
    c_valid = meta_ref[1]          # true class count (masks lane padding)
    inv_temp = invt_ref[0]         # 1 / temperature

    eps_sq = jnp.float32(1e-16)    # == (1e-8)**2, matches torch's max(norm, 1e-8) clamp

    # --- normalize x rows in f32; fold 1/temperature into the scale before bf16 cast ---
    x = x_ref[...].astype(jnp.float32)                                      # (TN, D)
    x_inv = lax.rsqrt(jnp.maximum(jnp.sum(x * x, axis=-1, keepdims=True), eps_sq))
    xn = (x * (x_inv * inv_temp)).astype(jnp.bfloat16)                      # (TN, D) bf16

    # cosine-similarity logits (already divided by temperature) on the MXU, f32 accumulate.
    # Proxies were pre-normalized / pre-transposed / class-padded in the wrapper.
    logits = jnp.dot(xn, pT_ref[...], preferred_element_type=jnp.float32)   # (TN, CP)

    # mask padded classes
    class_idx = lax.broadcasted_iota(jnp.int32, (tn, cp), 1)                # (TN, CP)
    logits = jnp.where(class_idx < c_valid, logits, jnp.float32(-1e30))

    y = y_ref[...]                                                          # (TN, 1) int32

    # ---- CrossEntropyLoss(reduction='none'): loss_i = logsumexp(logits_i) - logits[i, y_i]
    row_max = jnp.max(logits, axis=-1, keepdims=True)                       # (TN, 1)
    shifted = logits - row_max
    if use_bf16_exp:
        ex = jnp.exp(shifted.astype(jnp.bfloat16)).astype(jnp.float32)      # bf16 EUP
    else:
        ex = jnp.exp(shifted)                                               # f32 EUP (v5e)
    lse = jnp.log(jnp.sum(ex, axis=-1, keepdims=True)) + row_max
    picked = jnp.sum(jnp.where(class_idx == y, logits, jnp.float32(0.0)),
                     axis=-1, keepdims=True)
    per_loss = lse - picked                                                 # (TN, 1)

    # ---- predict(): argmax over classes (softmax is monotone); reuse row_max,
    # first-max index to match torch.max tie-breaking
    cand = jnp.where(logits == row_max, class_idx, jnp.int32(cp))
    preds = jnp.min(cand, axis=-1, keepdims=True)                           # (TN, 1)
    correct = (preds == y).astype(jnp.float32)

    # mask rows beyond the true batch size (un-padded partial last tile may hold garbage)
    row_idx = i * tn + lax.broadcasted_iota(jnp.int32, (tn, 1), 0)
    valid = row_idx < n_valid

    loss_sum = jnp.sum(jnp.where(valid, per_loss, jnp.float32(0.0)), keepdims=True)
    corr_sum = jnp.sum(jnp.where(valid, correct, jnp.float32(0.0)), keepdims=True)

    # (8, 128)-aligned, lane-dense partial-sum blocks (reduced in the wrapper)
    loss_part_ref[...] = jnp.broadcast_to(loss_sum, (_SUBLANE, _LANE))
    corr_part_ref[...] = jnp.broadcast_to(corr_sum, (_SUBLANE, _LANE))


def proxy_loss(x, y, proxies, temperature=1.0, block_n=1024):
    """x: (N, D) float, y: (N,) int, proxies: (C, D) float -> (loss, acc) f32 scalars."""
    n, d = x.shape
    c, d2 = proxies.shape
    assert d == d2, "embedding dims of x and proxies must match"

    # --- proxies: normalize once (f32), cast bf16, transpose + lane-pad classes ---
    cp = max(_LANE, _round_up(c, _LANE))
    p = proxies.astype(jnp.float32)
    p_inv = lax.rsqrt(jnp.maximum(jnp.sum(p * p, axis=-1, keepdims=True),
                                  jnp.float32(1e-16)))
    pn = (p * p_inv).astype(jnp.bfloat16)                                   # (C, D)
    pT = jnp.zeros((d, cp), dtype=jnp.bfloat16).at[:, :c].set(pn.T)         # (D, CP)
    # TODO(synk): for very large class counts the (D, CP) operand needs a second grid
    # axis with an online-softmax accumulator (class tiling) instead of one resident block.

    # --- per-generation VMEM budget: 64 MiB (v7x) vs 128 MiB (v5e/v6e), minus headroom ---
    vmem_cap = _vmem_capacity_bytes()
    budget = vmem_cap - max(12 * 1024 * 1024, vmem_cap // 8)

    # --- TN sizing: the grid-invariant bf16 proxy (single buffer) comes off the top;
    # only terms that actually scale with TN participate in the shrink. ---
    x_bytes = jnp.dtype(x.dtype).itemsize
    resident = d * cp * 2                              # bf16 proxies, Buffered(1)
    avail = budget - resident - (1 << 20)              # 1 MiB slack for y / outputs / misc
    per_row = d * (2 * x_bytes + 6) + 16 * cp + 32     # 2 x-bufs + f32/bf16 temps + ~4 (TN,CP) temps
    avail = max(avail, per_row * _SUBLANE)             # degrade gracefully for huge CP
    tn_cap = max(_SUBLANE, (avail // per_row) // _SUBLANE * _SUBLANE)

    tn = min(block_n, tn_cap, _round_up(n, _SUBLANE))
    if n > _SUBLANE:  # keep >= 2 tiles so both v7x TensorCores get work ("parallel" axis)
        tn = min(tn, _round_up(_cdiv(n, 2), _SUBLANE))
    tn = max(_round_up(tn, _SUBLANE), _SUBLANE)
    num_tiles = _cdiv(n, tn)

    y2 = y.astype(jnp.int32).reshape(n, 1)
    meta = jnp.array([n, c], dtype=jnp.int32)                      # SMEM scalars
    inv_t = jnp.array([1.0 / float(temperature)], dtype=jnp.float32)

    if hasattr(pl, "Buffered"):
        proxy_spec = pl.BlockSpec((d, cp), lambda i: (0, 0),
                                  pipeline_mode=pl.Buffered(1))    # resident, single buffer
    else:  # older jax without pipeline_mode: fall back to default buffering
        proxy_spec = pl.BlockSpec((d, cp), lambda i: (0, 0))

    kernel = functools.partial(_proxy_loss_kernel, _eup_supports_bf16())

    loss_parts, corr_parts = pl.pallas_call(
        kernel,
        out_shape=(
            jax.ShapeDtypeStruct((num_tiles * _SUBLANE, _LANE), jnp.float32),
            jax.ShapeDtypeStruct((num_tiles * _SUBLANE, _LANE), jnp.float32),
        ),
        grid=(num_tiles,),
        in_specs=[
            pl.BlockSpec(memory_space=pltpu.MemorySpace.SMEM),     # [n, c]
            pl.BlockSpec(memory_space=pltpu.MemorySpace.SMEM),     # [1 / temperature]
            pl.BlockSpec((tn, d), lambda i: (i, 0)),               # streamed x tiles
            proxy_spec,                                            # resident bf16 proxies
            pl.BlockSpec((tn, 1), lambda i: (i, 0)),               # labels
        ],
        out_specs=(
            pl.BlockSpec((_SUBLANE, _LANE), lambda i: (i, 0)),
            pl.BlockSpec((_SUBLANE, _LANE), lambda i: (i, 0)),
        ),
        compiler_params=pltpu.CompilerParams(
            dimension_semantics=("parallel",),
            vmem_limit_bytes=int(budget),
        ),
    )(meta, inv_t, x, pT, y2)

    inv_n = jnp.float32(1.0 / n)
    loss = jnp.sum(loss_parts[::_SUBLANE, 0]) * inv_n
    acc = jnp.sum(corr_parts[::_SUBLANE, 0]) * inv_n
    return loss, acc


if __name__ == "__main__":
    key = jax.random.PRNGKey(0)
    kx, kp, ky = jax.random.split(key, 3)

    # Reference 1: mirrors the kernel's bf16 matmul path (tight match).
    def ref_bf16(x, y, proxies, T=1.0):
        xi = lax.rsqrt(jnp.maximum(jnp.sum(x * x, -1, keepdims=True), 1e-16))
        pi = lax.rsqrt(jnp.maximum(jnp.sum(proxies * proxies, -1, keepdims=True), 1e-16))
        xn = (x * xi * (1.0 / T)).astype(jnp.bfloat16)
        pn = (proxies * pi).astype(jnp.bfloat16)
        logits = jnp.dot(xn, pn.T, preferred_element_type=jnp.float32)
        lse = jax.scipy.special.logsumexp(logits, axis=-1)
        l = (lse - logits[jnp.arange(x.shape[0]), y]).mean()
        preds = jnp.argmax(logits, axis=-1)
        a = (preds == y).astype(jnp.float32).mean()
        return l, a

    # Reference 2: full-f32 reference of the torch module (loose tolerance).
    def ref_f32(x, y, proxies, T=1.0):
        xn = x / jnp.maximum(jnp.linalg.norm(x, axis=-1, keepdims=True), 1e-8)
        pn = proxies / jnp.maximum(jnp.linalg.norm(proxies, axis=-1, keepdims=True), 1e-8)
        logits = (xn @ pn.T) / T
        lse = jax.scipy.special.logsumexp(logits, axis=-1)
        l = (lse - logits[jnp.arange(x.shape[0]), y]).mean()
        preds = jnp.argmax(logits, axis=-1)
        a = (preds == y).astype(jnp.float32).mean()
        return l, a

    jitted = jax.jit(proxy_loss)

    # case 1: tiny single-tile shapes (batch=8, hidden=32, classes=4)
    N, D, C = 8, 32, 4
    x = jax.random.normal(kx, (N, D), dtype=jnp.float32)
    proxies = jax.random.normal(kp, (C, D), dtype=jnp.float32)
    y = jax.random.randint(ky, (N,), 0, C, dtype=jnp.int32)
    loss, acc = jitted(x, y, proxies)
    jax.block_until_ready((loss, acc))
    rl_b, ra_b = ref_bf16(x, y, proxies)
    rl_f, _ = ref_f32(x, y, proxies)
    assert jnp.allclose(loss, rl_b, atol=2e-2, rtol=1e-2), (loss, rl_b)
    assert jnp.allclose(acc, ra_b, atol=1e-6), (acc, ra_b)
    assert jnp.allclose(loss, rl_f, atol=5e-2), (loss, rl_f)

    # case 2: multiple tiles + un-padded partial last tile (row-validity masking path)
    N2 = 20
    x2 = jax.random.normal(kx, (N2, D), dtype=jnp.float32)
    proxies2 = jax.random.normal(kp, (C, D), dtype=jnp.float32)
    y2 = jax.random.randint(ky, (N2,), 0, C, dtype=jnp.int32)
    loss2, acc2 = jitted(x2, y2, proxies2)
    jax.block_until_ready((loss2, acc2))
    rl2, ra2 = ref_bf16(x2, y2, proxies2)
    assert jnp.allclose(loss2, rl2, atol=2e-2, rtol=1e-2), (loss2, rl2)
    assert jnp.allclose(acc2, ra2, atol=1e-6), (acc2, ra2)

    print("KERNEL_OK")
</pallas_src>

<mosaic_0001>
module attributes {stable_mosaic.version = 11 : i64} {
  func.func @_proxy_loss_kernel(%arg0: i32, %arg1: memref<2xi32, #tpu.memory_space<smem>>, %arg2: memref<1xf32, #tpu.memory_space<smem>>, %arg3: memref<8x32xf32, #tpu.memory_space<vmem>>, %arg4: memref<32x128xbf16, #tpu.memory_space<vmem>>, %arg5: memref<8x1xi32, #tpu.memory_space<vmem>>, %arg6: memref<8x128xf32, #tpu.memory_space<vmem>>, %arg7: memref<8x128xf32, #tpu.memory_space<vmem>>) attributes {dimension_semantics = [#tpu.dimension_semantics<parallel>], iteration_bounds = array<i64: 1>, scalar_prefetch = 0 : i64, scratch_operands = 0 : i64, tpu.core_type = #tpu.core_type<tc>, window_params = [{transform_indices = @transform_0, window_bounds = array<i64: 2>}, {transform_indices = @transform_1, window_bounds = array<i64: 1>}, {transform_indices = @transform_2, window_bounds = array<i64: 8, 32>}, {pipeline_mode = #tpu.pipeline_mode<synchronous>, transform_indices = @transform_3, window_bounds = array<i64: 32, 128>}, {transform_indices = @transform_4, window_bounds = array<i64: 8, 1>}, {transform_indices = @transform_5, window_bounds = array<i64: 8, 128>}, {transform_indices = @transform_6, window_bounds = array<i64: 8, 128>}]} {
    %c0 = arith.constant 0 : index
    %0 = memref.load %arg1[%c0] : memref<2xi32, #tpu.memory_space<smem>>
    %c1 = arith.constant 1 : index
    %1 = memref.load %arg1[%c1] : memref<2xi32, #tpu.memory_space<smem>>
    %c0_0 = arith.constant 0 : index
    %2 = memref.load %arg2[%c0_0] : memref<1xf32, #tpu.memory_space<smem>>
    %c0_1 = arith.constant 0 : index
    %c0_2 = arith.constant 0 : index
    %3 = vector.load %arg3[%c0_1, %c0_2] : memref<8x32xf32, #tpu.memory_space<vmem>>, vector<8x32xf32>
    %4 = arith.mulf %3, %3 : vector<8x32xf32>
    %cst = arith.constant dense<0.000000e+00> : vector<8xf32>
    %5 = vector.multi_reduction <add>, %4, %cst [1] : vector<8x32xf32> to vector<8xf32>
    %6 = vector.shape_cast %5 : vector<8xf32> to vector<8x1xf32>
    %cst_3 = arith.constant 1.000000e-16 : f32
    %7 = vector.broadcast %cst_3 : f32 to vector<8x1xf32>
    %8 = arith.maximumf %6, %7 : vector<8x1xf32>
    %9 = math.rsqrt %8 : vector<8x1xf32>
    %10 = vector.broadcast %2 : f32 to vector<8x1xf32>
    %11 = arith.mulf %9, %10 : vector<8x1xf32>
    %12 = vector.broadcast %11 : vector<8x1xf32> to vector<8x32xf32>
    %13 = arith.mulf %3, %12 : vector<8x32xf32>
    %14 = arith.truncf %13 : vector<8x32xf32> to vector<8x32xbf16>
    %c0_4 = arith.constant 0 : index
    %c0_5 = arith.constant 0 : index
    %15 = vector.load %arg4[%c0_4, %c0_5] : memref<32x128xbf16, #tpu.memory_space<vmem>>, vector<32x128xbf16>
    %cst_6 = arith.constant dense<0.000000e+00> : vector<8x128xf32>
    %16 = tpu.matmul %14, %15, %cst_6 {dimension_numbers = #tpu.dot_dimension_numbers<[1], [0], [0], [1], [0, 0, 1, 1], [], []>} : vector<8x32xbf16>, vector<32x128xbf16>, vector<8x128xf32> -> vector<8x128xf32>
    %17 = tpu.iota {dimensions = array<i32: 1>} : vector<8x128xi32>
    %18 = vector.broadcast %1 : i32 to vector<8x128xi32>
    %19 = arith.cmpi slt, %17, %18 : vector<8x128xi32>
    %cst_7 = arith.constant -1.000000e+30 : f32
    %20 = vector.broadcast %cst_7 : f32 to vector<8x128xf32>
    %21 = arith.select %19, %16, %20 : vector<8x128xi1>, vector<8x128xf32>
    %c0_8 = arith.constant 0 : index
    %c0_9 = arith.constant 0 : index
    %22 = vector.load %arg5[%c0_8, %c0_9] : memref<8x1xi32, #tpu.memory_space<vmem>>, vector<8x1xi32>
    %cst_10 = arith.constant dense<0xFF800000> : vector<8xf32>
    %23 = vector.multi_reduction <maximumf>, %21, %cst_10 [1] : vector<8x128xf32> to vector<8xf32>
    %24 = vector.shape_cast %23 : vector<8xf32> to vector<8x1xf32>
    %25 = vector.broadcast %24 : vector<8x1xf32> to vector<8x128xf32>
    %26 = arith.subf %21, %25 : vector<8x128xf32>
    %27 = math.exp %26 : vector<8x128xf32>
    %cst_11 = arith.constant dense<0.000000e+00> : vector<8xf32>
    %28 = vector.multi_reduction <add>, %27, %cst_11 [1] : vector<8x128xf32> to vector<8xf32>
    %29 = vector.shape_cast %28 : vector<8xf32> to vector<8x1xf32>
    %30 = math.log %29 : vector<8x1xf32>
    %31 = arith.addf %30, %24 : vector<8x1xf32>
    %32 = vector.broadcast %22 : vector<8x1xi32> to vector<8x128xi32>
    %33 = arith.cmpi eq, %17, %32 : vector<8x128xi32>
    %cst_12 = arith.constant 0.000000e+00 : f32
    %34 = vector.broadcast %cst_12 : f32 to vector<8x128xf32>
    %35 = arith.select %33, %21, %34 : vector<8x128xi1>, vector<8x128xf32>
    %cst_13 = arith.constant dense<0.000000e+00> : vector<8xf32>
    %36 = vector.multi_reduction <add>, %35, %cst_13 [1] : vector<8x128xf32> to vector<8xf32>
    %37 = vector.shape_cast %36 : vector<8xf32> to vector<8x1xf32>
    %38 = arith.subf %31, %37 : vector<8x1xf32>
    %39 = vector.broadcast %24 : vector<8x1xf32> to vector<8x128xf32>
    %40 = arith.cmpf oeq, %21, %39 : vector<8x128xf32>
    %c128_i32 = arith.constant 128 : i32
    %41 = vector.broadcast %c128_i32 : i32 to vector<8x128xi32>
    %42 = arith.select %40, %17, %41 : vector<8x128xi1>, vector<8x128xi32>
    %cst_14 = arith.constant dense<2147483647> : vector<8xi32>
    %43 = vector.multi_reduction <minsi>, %42, %cst_14 [1] : vector<8x128xi32> to vector<8xi32>
    %44 = vector.shape_cast %43 : vector<8xi32> to vector<8x1xi32>
    %45 = arith.cmpi eq, %44, %22 : vector<8x1xi32>
    %46 = arith.extui %45 : vector<8x1xi1> to vector<8x1xi32>
    %47 = arith.sitofp %46 : vector<8x1xi32> to vector<8x1xf32>
    %c8_i32 = arith.constant 8 : i32
    %48 = arith.muli %arg0, %c8_i32 : i32
    %49 = tpu.iota {dimensions = array<i32: 0>} : vector<8x1xi32>
    %50 = vector.broadcast %48 : i32 to vector<8x1xi32>
    %51 = arith.addi %50, %49 : vector<8x1xi32>
    %52 = vector.broadcast %0 : i32 to vector<8x1xi32>
    %53 = arith.cmpi slt, %51, %52 : vector<8x1xi32>
    %cst_15 = arith.constant 0.000000e+00 : f32
    %54 = vector.broadcast %cst_15 : f32 to vector<8x1xf32>
    %55 = arith.select %53, %38, %54 : vector<8x1xi1>, vector<8x1xf32>
    %56 = vector.shape_cast %55 : vector<8x1xf32> to vector<1x8x1xf32>
    %cst_16 = arith.constant dense<0.000000e+00> : vector<1xf32>
    %57 = vector.multi_reduction <add>, %56, %cst_16 [1, 2] : vector<1x8x1xf32> to vector<1xf32>
    %58 = vector.shape_cast %57 : vector<1xf32> to vector<1x1x1xf32>
    %59 = vector.extract %58[0, 0, 0] : f32 from vector<1x1x1xf32>
    %60 = vector.broadcast %59 : f32 to vector<1x1xf32>
    %cst_17 = arith.constant 0.000000e+00 : f32
    %61 = vector.broadcast %cst_17 : f32 to vector<8x1xf32>
    %62 = arith.select %53, %47, %61 : vector<8x1xi1>, vector<8x1xf32>
    %63 = vector.shape_cast %62 : vector<8x1xf32> to vector<1x8x1xf32>
    %cst_18 = arith.constant dense<0.000000e+00> : vector<1xf32>
    %64 = vector.multi_reduction <add>, %63, %cst_18 [1, 2] : vector<1x8x1xf32> to vector<1xf32>
    %65 = vector.shape_cast %64 : vector<1xf32> to vector<1x1x1xf32>
    %66 = vector.extract %65[0, 0, 0] : f32 from vector<1x1x1xf32>
    %67 = vector.broadcast %66 : f32 to vector<1x1xf32>
    %68 = vector.shape_cast %60 : vector<1x1xf32> to vector<1x1xf32>
    %69 = vector.broadcast %68 : vector<1x1xf32> to vector<8x128xf32>
    %c0_19 = arith.constant 0 : index
    %c0_20 = arith.constant 0 : index
    %70 = vector.load %arg6[%c0_19, %c0_20] : memref<8x128xf32, #tpu.memory_space<vmem>>, vector<8x128xf32>
    tpu.vector_store %arg6[%c0_19, %c0_20], %69 {strides = array<i32>} : memref<8x128xf32, #tpu.memory_space<vmem>>, vector<8x128xf32>,
    %71 = vector.shape_cast %67 : vector<1x1xf32> to vector<1x1xf32>
    %72 = vector.broadcast %71 : vector<1x1xf32> to vector<8x128xf32>
    %c0_21 = arith.constant 0 : index
    %c0_22 = arith.constant 0 : index
    %73 = vector.load %arg7[%c0_21, %c0_22] : memref<8x128xf32, #tpu.memory_space<vmem>>, vector<8x128xf32>
    tpu.vector_store %arg7[%c0_21, %c0_22], %72 {strides = array<i32>} : memref<8x128xf32, #tpu.memory_space<vmem>>, vector<8x128xf32>,
    return
  }
  func.func @transform_0(%arg0: i32) -> i32 {
    %c0_i32 = arith.constant 0 : i32
    %c0_i32_0 = arith.constant 0 : i32
    return %c0_i32 : i32
  }
  func.func @transform_1(%arg0: i32) -> i32 {
    %c0_i32 = arith.constant 0 : i32
    %c0_i32_0 = arith.constant 0 : i32
    return %c0_i32 : i32
  }
  func.func @transform_2(%arg0: i32) -> (i32, i32) {
    %c0_i32 = arith.constant 0 : i32
    %c0_i32_0 = arith.constant 0 : i32
    return %arg0, %c0_i32 : i32, i32
  }
  func.func @transform_3(%arg0: i32) -> (i32, i32) {
    %c0_i32 = arith.constant 0 : i32
    %c0_i32_0 = arith.constant 0 : i32
    %c0_i32_1 = arith.constant 0 : i32
    return %c0_i32, %c0_i32_0 : i32, i32
  }
  func.func @transform_4(%arg0: i32) -> (i32, i32) {
    %c0_i32 = arith.constant 0 : i32
    %c0_i32_0 = arith.constant 0 : i32
    return %arg0, %c0_i32 : i32, i32
  }
  func.func @transform_5(%arg0: i32) -> (i32, i32) {
    %c0_i32 = arith.constant 0 : i32
    %c0_i32_0 = arith.constant 0 : i32
    return %arg0, %c0_i32 : i32, i32
  }
  func.func @transform_6(%arg0: i32) -> (i32, i32) {
    %c0_i32 = arith.constant 0 : i32
    %c0_i32_0 = arith.constant 0 : i32
    return %arg0, %c0_i32 : i32, i32
  }
}

</mosaic_0001>

<bundles_post_ra>
// kernel: proxy_loss.1
= control target key start
LH: loop header
LB: loop body
LE: loop exit
PB: predicated region body
PF: predicated region fallthrough
CT: control target
= control target key end

     0   :  { %13 = vsyncpa [#allocation4], 0  ;;  %s314_s0 = inlined_call_operand.vmem [shape: s32[2], index: 0, kind: input, shape index: {}]   ;;  %s315_s1 = inlined_call_operand.<no memory space> [shape: f32[1], index: 1, kind: input, shape index: {}]   ;;  %s316_s2 = inlined_call_operand.vmem [shape: f32[8,32], index: 2, kind: input, shape index: {}]   ;;  %s317_s3 = inlined_call_operand.vmem [shape: bf16[32,128], index: 3, kind: input, shape index: {}]   ;;  %s318_s4 = inlined_call_operand.vmem [shape: s32[8,1], index: 4, kind: input, shape index: {}]   ;;  %s319_s5 = inlined_call_operand.vmem [shape: f32[8,128], index: 5, kind: output, shape index: {0}]   ;;  %s320_s6 = inlined_call_operand.vmem [shape: f32[8,128], index: 6, kind: output, shape index: {1}]  }
   0x1   :  { %s20_s23 = sshll.u32 %s314_s0, 4  ;;  %s21_s23 = int_to_ptr.vmem [resolvable:$true] %s20_s23 }
   0x2   :  { %s231_s24 = scalar_lea.vmem %s21_s23, 16  ;;  %p236_p1 = scmp.lt.s32.totalorder %s21_s23, %s21_s23 }
   0x3   :  { %p232_p0 = scmp.ne.s32.totalorder %s21_s23, %s231_s24  ;;  %p237_p2 = scmp.lt.s32.totalorder %s231_s24, %s231_s24 }
   0x5   :  { %p238_p3 = por %p237_p2, %p236_p1 }
   0x7   :  { %p239_p4 = pnand %p238_p3, %p232_p0 }
   0x9   :  { %242 = shalt.err (!%p239_p4)
}
   0xa   :  { %s245_s25 = smov [#allocation3]  }
   0xb   :  { %23 = dma.vmem_to_smem %s21_s23, 16, %s245_s25, [#allocation4]  }
   0xc   :  { %243 = dma.done.wait [#allocation4], 16  }
   0xd   :  { %244 = vsyncadd [#allocation4], 4294967280 }
   0xe   :  { %35 = sfence }
   0xf   :  { %v40_v0 = vld [vmem:[%s316_s2] sm:$0xff]  ;;  %vm42_vm0 = vcmask 261120   ;;  %v246_v4 = vmov 0.0   ;;  %vm247_vm1 = vmmov 0   ;;  %v224_v5 = vld [vmem:[%s317_s3 + $0x8] sm:$0xff]   ;;  %v48_v8 = vstv %s315_s1  ;;  %s197_s8 = sld [smem:[#allocation3 + $0x1]] }
  0x10   :  { %v41_v1 = vmul.f32 %v40_v0, %v40_v0  ;;  %v223_v3 = vld [vmem:[%s317_s3] sm:$0xff]   ;;  %205 = vmatprep.subr.bf16.mxu0 %v246_v4  ;;  %209 = vmatprep.mubr.msk.bf16.mxu0 %vm247_vm1, %v246_v4  ;;  %v111_v13 = vlaneseq  ;;  %v248_v21 = vmov 0   ;;  %s37_s9 = sld [smem:[#allocation3]]  ;;  %vm162_vm8 = vcmask 7168  }
  0x11   :  { %206 = vmatpush3.bf16.msra.mxu0 %v223_v3  ;;  %221 = vset.pattern.permute.xlu1 %v248_v21  ;;  %v116_v29 = vld [vmem:[%s318_s4] sm:$0xff] }
  0x12   :  { %v43_v2 = vsel %vm42_vm0, %v41_v1, 0.0  ;;  %207 = vmatprep.subr.bf16.mxu0 %v246_v4  ;;  %v112_v14 = vand.u32 127, %v111_v13  ;;  %222 = vset.pattern.permute.xlu0 %v248_v21  ;;  %v156_v41 = vshrl.u32 %v111_v13, 7 }
  0x13   :  { %44 = vadd.xlane.f32.xlu0 %v43_v2 }
  0x15   :  { %208 = vmatpush3.bf16.msra.mxu0 %v224_v5  ;;  %v113_v15 = vstv %s197_s8 }
  0x16   :  { %vm114_vm2 = vcmp.lt.s32.totalorder %v112_v14, %v113_v15  ;;  %v159_v44 = vstv %s37_s9 }
  0x17   :  { %vm160_vm6 = vcmp.lt.s32.totalorder %v156_v41, %v159_v44 }
  0xa0   :  { %v45_v6 = vpop.xlane.xlu0 %44 }
  0xa1   :  { %v46_v7 = vmax.f32 %v45_v6, 1e-16 }
  0xa3   :  { %225 = vrsqrt.f32 %v46_v7 }
  0xad   :  { %v226_v9 = vpop.eup %225 }
  0xae   :  { %v49_v10 = vmul.f32 %v226_v9, %v48_v8 }
  0xb0   :  { %v50_v11 = vmul.f32 %v49_v10, %v40_v0 }
  0xb2   :  { %v51_v12 = vpack.c.bf16 %v50_v11, %v50_v11 }
  0xb4   :  { %210 = vmatmul.mubr.msk.bf16.vlgmr.msra.gmra.mrb[0].mxu0 %vm42_vm0, %v51_v12 }
 0x187   :  { %v105_v16 = vpop.f32.mrb[0].mxu0 }
 0x188   :  { %v115_v17 = vsel %vm114_vm2, %v105_v16, -1e+30  ;;  %v211_v18 = vpop.f32.mrb[1].mxu0 }
 0x189   :  { %v108_v19 = vpop.f32.mrb[2].mxu0  ;;  %117 = vmax.xlane.f32.xlu0 %v115_v17 }
 0x18a   :  { %v212_v20 = vpop.f32.mrb[3].mxu0 }
 0x216   :  { %v118_v22 = vpop.xlane.xlu0 %117 }
 0x217   :  { %v119_v23 = vsub.f32 %v115_v17, %v118_v22  ;;  %vm135_vm3 = vcmp.eq.f32.partialorder %v115_v17, %v118_v22 }
 0x218   :  { %v136_v24 = vsel %vm135_vm3, %v112_v14, 128 }
 0x219   :  { %v120_v25 = vmul.f32 1.442695, %v119_v23  ;;  %v138_v26 = vshra.s32 %v136_v24, 16  ;;  %v137_v30 = vand.u32 65535, %v136_v24 }
 0x21b   :  { %227 = vpow2.f32 %v120_v25  ;;  %v140_v27 = vcvt.s32.f32 %v138_v26  ;;  %v139_v32 = vcvt.s32.f32 %v137_v30 }
 0x21d   :  { %141 = vmin.xlane.f32.xlu1 %v140_v27 }
 0x225   :  { %v228_v28 = vpop.eup %227 }
 0x226   :  { %122 = vadd.xlane.f32.xlu0 %v228_v28 }
 0x22e   :  { %128 = vperm.xlu1 %221, %v116_v29  }
 0x2aa   :  { %v142_v31 = vpop.xlane.xlu1 %141 }
 0x2ab   :  { %vm143_vm4 = vcmp.eq.f32.partialorder %v140_v27, %v142_v31  ;;  %v148_v38 = vcvt.f32.s32 %v142_v31 }
 0x2ac   :  { %v144_v33 = vsel %vm143_vm4, %v139_v32, inf }
 0x2ad   :  { %145 = vmin.xlane.f32.xlu0 %v144_v33  ;;  %v149_v42 = vshll.u32 %v148_v38, 16 }
 0x2ae   :  { %v129_v34 = vpop.permute.xlu1 %128 }
 0x2af   :  { %vm130_vm5 = vcmp.eq.s32.totalorder %v112_v14, %v129_v34 }
 0x2b0   :  { %v131_v35 = vsel %vm130_vm5, %v115_v17, 0.0 }
 0x2b1   :  { %132 = vadd.xlane.f32.xlu0 %v131_v35 }
 0x2b3   :  { %v123_v36 = vpop.xlane.xlu0 %122 }
 0x2b4   :  { %229 = vlog2.f32 %v123_v36 }
 0x2be   :  { %v230_v37 = vpop.eup %229 }
 0x2bf   :  { %v125_v39 = vmul.f32 0.6931472, %v230_v37 }
 0x2c1   :  { %v126_v46 = vadd.f32 %v125_v39, %v118_v22 }
 0x33a   :  { %v146_v40 = vpop.xlane.xlu0 %145 }
 0x33b   :  { %v147_v43 = vcvt.f32.s32 %v146_v40 }
 0x33d   :  { %v150_v45 = vadd.s32 %v149_v42, %v147_v43 }
 0x33e   :  { %v133_v47 = vpop.xlane.xlu0 %132 }
 0x33f   :  { %v134_v48 = vsub.f32 %v126_v46, %v133_v47  ;;  %vm151_vm7 = vcmp.eq.s32.totalorder %v150_v45, %v116_v29 }
 0x340   :  { %v201_v49 = vsel %vm151_vm7, 1.0, %v246_v4 }
 0x341   :  { %v173_v50 = vsel %vm160_vm6, %v201_v49, 0.0  ;;  %v161_v51 = vsel %vm160_vm6, %v134_v48, 0.0 }
 0x342   :  { %v174_v52 = vsel %vm162_vm8, %v173_v50, 0.0  ;;  %v163_v53 = vsel %vm162_vm8, %v161_v51, 0.0 }
 0x343   :  { %175 = vadd.xlane.f32.xlu1 %v174_v52  ;;  %164 = vadd.xlane.f32.xlu0 %v163_v53 }
 0x3d0   :  { %v176_v54 = vpop.xlane.xlu1 %175  ;;  %v165_v55 = vpop.xlane.xlu0 %164 }
 0x3d1   :  { %v177_v56 = vrot.slane %v176_v54, 4  ;;  %v166_v57 = vrot.slane %v165_v55, 4 }
 0x3d3   :  { %v178_v58 = vadd.f32 %v177_v56, %v176_v54  ;;  %v167_v59 = vadd.f32 %v166_v57, %v165_v55 }
 0x3d5   :  { %v179_v60 = vrot.slane %v178_v58, 2  ;;  %v168_v61 = vrot.slane %v167_v59, 2 }
 0x3d7   :  { %v180_v62 = vadd.f32 %v179_v60, %v178_v58  ;;  %v169_v63 = vadd.f32 %v168_v61, %v167_v59 }
 0x3d9   :  { %v170_v0 = vrot.slane %v169_v63, 1  ;;  %v181_v1 = vrot.slane %v180_v62, 1 }
 0x3db   :  { %v171_v2 = vadd.f32 %v170_v0, %v169_v63  ;;  %v182_v3 = vadd.f32 %v181_v1, %v180_v62 }
 0x3dd   :  { %213 = vpush %v171_v2 }
 0x3de   :  { %215 = vpush %v182_v3 }
 0x40e   :  { %s214_s4 = spop %213 }
 0x40f   :  { %v184_v4 = vstv %s214_s4  ;;  %s216_s10 = spop %215 }
 0x410   :  { %185 = vst [vmem:[%s319_s5] sm:$0xff] %v184_v4  ;;  %v186_v5 = vstv %s216_s10 }
 0x411   :  { %187 = vst [vmem:[%s320_s6] sm:$0xff] %v186_v5 }
 0x412   :  { %196 = vsyncpa [#allocation4], 1 }

</bundles_post_ra>
